<compile_context>
chip_gen: v5e
topology: v5e:2x2
jax: 0.10.0
libtpu: 0.0.40
codegen_flags: <defaults>
</compile_context>

<pallas_src>
import functools

import jax
import jax.numpy as jnp
from jax import lax
from jax.experimental import pallas as pl
from jax.experimental.pallas import tpu as pltpu

EPS = 1e-5


# ---------------------------------------------------------------------------
# Kernel: one MXU matmul + single-pass BatchNorm(train) + ReLU per O-tile.
# ---------------------------------------------------------------------------
def _matmul_bn_relu_kernel(xk_ref, w_ref, o_ref, *, NL):
    """xk_ref: (K*C, NLp) bf16 resident im2col (pad columns are zero)
       w_ref : (TO, K*C)  bf16 weight O-tile (tap-major, channel-minor)
       o_ref : (TO, NLp)  bf16 (stage 1) / f32 (stage 2)
    """
    # Conv1d('same') as one im2col matmul; f32 accumulation on the MXU.
    y = jnp.dot(w_ref[...], xk_ref[...], preferred_element_type=jnp.float32)

    # BatchNorm1d (training mode), single pass: padded lane columns of xk are
    # zero, so y is zero there and plain sums over NLp equal sums over the NL
    # real columns.  Biased variance /NL, per-channel (per sublane row).
    inv_n = 1.0 / float(NL)
    mean = jnp.sum(y, axis=1, keepdims=True) * inv_n
    var = jnp.sum(y * y, axis=1, keepdims=True) * inv_n - mean * mean

    # gamma=1, beta=0; ReLU fused.
    o = jnp.maximum((y - mean) * lax.rsqrt(var + EPS), 0.0)
    o_ref[...] = o.astype(o_ref.dtype)


# ---------------------------------------------------------------------------
# Helpers
# ---------------------------------------------------------------------------
def _ceil_to(v, m):
    return ((v + m - 1) // m) * m


def _vmem_capacity_bytes():
    try:
        return int(pltpu.get_tpu_info().vmem_capacity_bytes)
    except Exception:
        return 64 * 2**20  # conservative (v7x per-TensorCore)


def _pick_o_tile(O):
    # Prefer >= 8 total grid steps (>= 4 per core under megacore "parallel"
    # sharding) with TO capped at 128; else any aligned tile with >= 2 steps;
    # else one full-extent block (small channel counts).
    for t in (128, 64):
        if O % t == 0 and O // t >= 8:
            return t
    for t in (128, 64, 32, 16, 8):
        if O % t == 0 and O // t >= 2:
            return t
    return O


def _im2col(x2d, *, K, L, NL):
    """Wrapper-side (XLA) im2col: (C, NLp) -> (K*C, NLp), tap-major rows.

    Sample-boundary taps and all padded lane columns (col >= NL) are zeroed,
    so the kernel needs no masks at all.
    """
    _, NLp = x2d.shape
    col = jnp.arange(NLp)[None, :]
    pos = col % L
    valid = col < NL
    half = (K - 1) // 2
    taps = []
    for k in range(K):
        off = k - half                              # tap value at p is x[p + off]
        t = x2d if off == 0 else jnp.roll(x2d, shift=-off, axis=1)
        if off < 0:
            ok = valid & (pos >= -off)              # would cross left sample edge
        elif off > 0:
            ok = valid & (pos < L - off)            # would cross right sample edge
        else:
            ok = valid
        taps.append(jnp.where(ok, t, 0).astype(x2d.dtype))
    return jnp.concatenate(taps, axis=0)            # (K*C, NLp)


def _conv_bn_relu_stage(xk, w_mat, *, NL, out_dtype):
    KC, NLp = xk.shape
    O = w_mat.shape[0]
    TO = _pick_o_tile(O)
    grid = (O // TO,)
    out_isz = jnp.dtype(out_dtype).itemsize

    flops = 2 * O * KC * NLp + 10 * O * NLp
    bytes_accessed = KC * NLp * 2 + O * KC * 2 + O * NLp * out_isz

    # Live-VMEM estimate: resident im2col, double-buffered weight / output
    # blocks, f32 epilogue temporaries.
    est = (2 * KC * NLp * 2 + 2 * TO * KC * 2
           + 2 * TO * NLp * out_isz + 4 * TO * NLp * 4)
    cap = _vmem_capacity_bytes()
    vmem_limit = int(min(0.75 * cap, max(32 * 2**20, 2 * est)))

    kernel = functools.partial(_matmul_bn_relu_kernel, NL=NL)
    return pl.pallas_call(
        kernel,
        out_shape=jax.ShapeDtypeStruct((O, NLp), out_dtype),
        grid=grid,
        in_specs=[
            pl.BlockSpec((KC, NLp), lambda i: (0, 0)),   # im2col: resident
            pl.BlockSpec((TO, KC), lambda i: (i, 0)),    # weight O-tile
        ],
        out_specs=pl.BlockSpec((TO, NLp), lambda i: (i, 0)),
        compiler_params=pltpu.CompilerParams(
            dimension_semantics=("parallel",),
            vmem_limit_bytes=vmem_limit),
        cost_estimate=pl.CostEstimate(
            flops=flops, transcendentals=O, bytes_accessed=bytes_accessed),
    )(xk, w_mat)


# ---------------------------------------------------------------------------
# Public wrapper
# ---------------------------------------------------------------------------
def unet_block_1d(x, w1, b1, w2, b2):
    """x: (N, C, L) f32; w*: (O, C, K), b*: (O,) -- PyTorch Conv1d layouts.

    b1/b2 are accepted for API parity but are algebraically cancelled by
    training-mode BatchNorm (gamma=1, beta=0): a per-channel constant shifts
    the mean and leaves the normalized activation unchanged.
    """
    del b1, b2
    N, C, L = x.shape
    O1, _, K = w1.shape
    O2 = w2.shape[0]
    NL = N * L
    NLp = max(128, _ceil_to(NL, 128))
    Cp = _ceil_to(C, 16)
    O1p = _ceil_to(O1, 16)
    O2p = _ceil_to(O2, 16)

    # Lane-dense activations (Cp, NLp) bf16 (zero-padded channels / columns).
    xt = jnp.transpose(x, (1, 0, 2)).reshape(C, NL).astype(jnp.bfloat16)
    xt = jnp.pad(xt, ((0, Cp - C), (0, NLp - NL)))

    # Channel-padded, im2col-flattened weights (tap-major, channel-minor), bf16.
    w1p = jnp.pad(w1, ((0, O1p - O1), (0, Cp - C), (0, 0)))
    w2p = jnp.pad(w2, ((0, O2p - O2), (0, O1p - O1), (0, 0)))
    w1m = jnp.transpose(w1p, (0, 2, 1)).reshape(O1p, K * Cp).astype(jnp.bfloat16)
    w2m = jnp.transpose(w2p, (0, 2, 1)).reshape(O2p, K * O1p).astype(jnp.bfloat16)

    # Stage 1: im2col of x built once wrapper-side, resident kernel operand.
    xk1 = _im2col(xt, K=K, L=L, NL=NL)
    h = _conv_bn_relu_stage(xk1, w1m, NL=NL, out_dtype=jnp.bfloat16)

    # Stage 2: im2col of h built once between the calls (XLA), resident operand.
    # TODO(synk): fuse both stages in one pallas_call on v5e/v6e (fits 128 MiB)
    # to remove the HBM round trip of h; add L-tiled path for very large N*L.
    hk = _im2col(h, K=K, L=L, NL=NL)
    y = _conv_bn_relu_stage(hk, w2m, NL=NL, out_dtype=jnp.float32)

    y = y[:O2, :NL].reshape(O2, N, L)
    return jnp.transpose(y, (1, 0, 2))                   # (N, O2, L)


# ---------------------------------------------------------------------------
# Pure-JAX f32 reference (verification only).
# ---------------------------------------------------------------------------
def _ref_conv_bn_relu(x, w, b):
    pad = (w.shape[-1] - 1) // 2
    y = lax.conv_general_dilated(
        x, w, window_strides=(1,), padding=[(pad, pad)],
        dimension_numbers=('NCH', 'OIH', 'NCH'))
    y = y + b[None, :, None]
    mean = jnp.mean(y, axis=(0, 2), keepdims=True)
    var = jnp.mean((y - mean) ** 2, axis=(0, 2), keepdims=True)
    return jnp.maximum((y - mean) * lax.rsqrt(var + EPS), 0.0)


def unet_block_1d_ref(x, w1, b1, w2, b2):
    return _ref_conv_bn_relu(_ref_conv_bn_relu(x, w1, b1), w2, b2)


if __name__ == "__main__":
    # Small shapes consistent with the module: (N, in_ch, L), Conv1d params.
    N, in_ch, out_ch, L, K = 2, 4, 16, 16, 3

    key = jax.random.PRNGKey(0)
    kx, kw1, kb1, kw2, kb2 = jax.random.split(key, 5)

    x = jax.random.normal(kx, (N, in_ch, L), dtype=jnp.float32)
    w1 = jax.random.normal(kw1, (out_ch, in_ch, K), dtype=jnp.float32) * 0.2
    b1 = jax.random.normal(kb1, (out_ch,), dtype=jnp.float32) * 0.1
    w2 = jax.random.normal(kw2, (out_ch, out_ch, K), dtype=jnp.float32) * 0.2
    b2 = jax.random.normal(kb2, (out_ch,), dtype=jnp.float32) * 0.1

    out = jax.block_until_ready(unet_block_1d(x, w1, b1, w2, b2))
    ref = unet_block_1d_ref(x, w1, b1, w2, b2)

    assert out.shape == ref.shape == (N, out_ch, L)
    # bf16 matmul operands / bf16-staged intermediate vs. f32 reference.
    assert jnp.allclose(out, ref, atol=5e-2, rtol=5e-2), "mismatch vs JAX reference"

    print("KERNEL_OK")
</pallas_src>

<mosaic_0001>
module attributes {stable_mosaic.version = 11 : i64} {
  func.func @_matmul_bn_relu_kernel(%arg0: i32, %arg1: memref<48x128xbf16, #tpu.memory_space<vmem>>, %arg2: memref<8x48xbf16, #tpu.memory_space<vmem>>, %arg3: memref<8x128xbf16, #tpu.memory_space<vmem>>) attributes {dimension_semantics = [#tpu.dimension_semantics<parallel>], iteration_bounds = array<i64: 2>, scalar_prefetch = 0 : i64, scratch_operands = 0 : i64, tpu.core_type = #tpu.core_type<tc>, window_params = [{pipeline_mode = #tpu.pipeline_mode<synchronous>, transform_indices = @transform_0, window_bounds = array<i64: 48, 128>}, {transform_indices = @transform_1, window_bounds = array<i64: 8, 48>}, {transform_indices = @transform_2, window_bounds = array<i64: 8, 128>}]} {
    %c0 = arith.constant 0 : index
    %c0_0 = arith.constant 0 : index
    %0 = vector.load %arg2[%c0, %c0_0] : memref<8x48xbf16, #tpu.memory_space<vmem>>, vector<8x48xbf16>
    %c0_1 = arith.constant 0 : index
    %c0_2 = arith.constant 0 : index
    %1 = vector.load %arg1[%c0_1, %c0_2] : memref<48x128xbf16, #tpu.memory_space<vmem>>, vector<48x128xbf16>
    %cst = arith.constant dense<0.000000e+00> : vector<8x128xf32>
    %2 = tpu.matmul %0, %1, %cst {dimension_numbers = #tpu.dot_dimension_numbers<[1], [0], [0], [1], [0, 0, 1, 1], [], []>} : vector<8x48xbf16>, vector<48x128xbf16>, vector<8x128xf32> -> vector<8x128xf32>
    %cst_3 = arith.constant dense<0.000000e+00> : vector<8xf32>
    %3 = vector.multi_reduction <add>, %2, %cst_3 [1] : vector<8x128xf32> to vector<8xf32>
    %4 = vector.shape_cast %3 : vector<8xf32> to vector<8x1xf32>
    %cst_4 = arith.constant 3.125000e-02 : f32
    %5 = vector.broadcast %cst_4 : f32 to vector<8x1xf32>
    %6 = arith.mulf %4, %5 : vector<8x1xf32>
    %7 = arith.mulf %2, %2 : vector<8x128xf32>
    %cst_5 = arith.constant dense<0.000000e+00> : vector<8xf32>
    %8 = vector.multi_reduction <add>, %7, %cst_5 [1] : vector<8x128xf32> to vector<8xf32>
    %9 = vector.shape_cast %8 : vector<8xf32> to vector<8x1xf32>
    %cst_6 = arith.constant 3.125000e-02 : f32
    %10 = vector.broadcast %cst_6 : f32 to vector<8x1xf32>
    %11 = arith.mulf %9, %10 : vector<8x1xf32>
    %12 = arith.mulf %6, %6 : vector<8x1xf32>
    %13 = arith.subf %11, %12 : vector<8x1xf32>
    %14 = vector.broadcast %6 : vector<8x1xf32> to vector<8x128xf32>
    %15 = arith.subf %2, %14 : vector<8x128xf32>
    %cst_7 = arith.constant 9.99999974E-6 : f32
    %16 = vector.broadcast %cst_7 : f32 to vector<8x1xf32>
    %17 = arith.addf %13, %16 : vector<8x1xf32>
    %18 = math.rsqrt %17 : vector<8x1xf32>
    %19 = vector.broadcast %18 : vector<8x1xf32> to vector<8x128xf32>
    %20 = arith.mulf %15, %19 : vector<8x128xf32>
    %cst_8 = arith.constant 0.000000e+00 : f32
    %21 = vector.broadcast %cst_8 : f32 to vector<8x128xf32>
    %22 = arith.maximumf %20, %21 : vector<8x128xf32>
    %23 = arith.truncf %22 : vector<8x128xf32> to vector<8x128xbf16>
    %c0_9 = arith.constant 0 : index
    %c0_10 = arith.constant 0 : index
    %24 = vector.load %arg3[%c0_9, %c0_10] : memref<8x128xbf16, #tpu.memory_space<vmem>>, vector<8x128xbf16>
    tpu.vector_store %arg3[%c0_9, %c0_10], %23 {strides = array<i32>} : memref<8x128xbf16, #tpu.memory_space<vmem>>, vector<8x128xbf16>,
    return
  }
  func.func @transform_0(%arg0: i32) -> (i32, i32) {
    %c0_i32 = arith.constant 0 : i32
    %c0_i32_0 = arith.constant 0 : i32
    %c0_i32_1 = arith.constant 0 : i32
    return %c0_i32, %c0_i32_0 : i32, i32
  }
  func.func @transform_1(%arg0: i32) -> (i32, i32) {
    %c0_i32 = arith.constant 0 : i32
    %c0_i32_0 = arith.constant 0 : i32
    return %arg0, %c0_i32 : i32, i32
  }
  func.func @transform_2(%arg0: i32) -> (i32, i32) {
    %c0_i32 = arith.constant 0 : i32
    %c0_i32_0 = arith.constant 0 : i32
    return %arg0, %c0_i32 : i32, i32
  }
}

</mosaic_0001>

<bundles_post_ra>
// kernel: tpu_custom_call.1
= control target key start
LH: loop header
LB: loop body
LE: loop exit
PB: predicated region body
PF: predicated region fallthrough
CT: control target
= control target key end

     0   :  { %7 = vsyncpa [#allocation3], 0  ;;  %s725_s0 = inlined_call_operand.hbm [shape: bf16[48,128], index: 0, kind: input, shape index: {}]   ;;  %s726_s1 = inlined_call_operand.hbm [shape: bf16[16,48], index: 1, kind: input, shape index: {}]   ;;  %s727_s2 = inlined_call_operand.hbm [shape: bf16[16,128], index: 2, kind: output, shape index: {}]  }
   0x1   :  { %8 = vsyncpa [#allocation6], 0 }
   0x2   :  { %10 = vsyncpa [#allocation6 + $0x1], 0 }
   0x3   :  { %11 = vsyncpa [#allocation4], 0 }
   0x4   :  { %13 = vsyncpa [#allocation4 + $0x1], 0  ;;  %s585_s9 = smov 0   ;;  %s587_s10 = smov 0  }
   0x5   :  { %s589_s11 = smov 0   ;;  %s591_s12 = smov 0  }
   0x6 LB: > { %s108_s15 = sshll.u32 %s725_s0, 4  ;;  %s609_s16 = sadd.s32 4294967295, %s565_s12   ;;  %s565_s12 = sphi %s591_s12, %s737_s12   ;;  %s561_s11 = sphi %s589_s11, %s736_s11   ;;  %s557_s10 = sphi %s587_s10, %s735_s10   ;;  %s553_s9 = sphi %s585_s9, %s734_s9   ;;  %s109_s15 = int_to_ptr.hbm [resolvable:$true] %s108_s15 }
   0x7   : > { %p345_p0 = scmp.ge.s32.totalorder %s565_s12, 1  ;;  %p61_p1 = scmp.eq.s32.totalorder %s609_s16, 0 }
   0x8   : > { %p97_p2 = scmp.lt.s32.totalorder %s565_s12, 3  ;;  %s567_s18 = smov [#allocation2]  }
   0x9   : > { %s110_s19 = sshll.u32 %s567_s18, 4  ;;  %s568_s20 = smov 64   ;;  %s111_s19 = int_to_ptr.vmem [resolvable:$true] %s110_s19 }
   0xa   : > { %p614_p3 = pnand %p345_p0, %p97_p2  ;;  %s569_s21 = smov 4  }
   0xb   : > { %s344_s22 = sadd.s32 4294967294, %s565_s12   ;;  %s625_s23 = sadd.s32 1, %s565_s12  }
   0xc   : > { %p382_p4 = pneg %p614_p3  ;;  %s47_s24 = sadd.s32 1, %s561_s11 }
   0xd   : > { %s44_s25 = ssub.s32 %s565_s12, %s625_s23  ;;  %p54_p7 = scmp.ne.s32.totalorder %s561_s11, %s557_s10 }
   0xe   : > { %p383_p6 = pnand %p382_p4, %p61_p1  ;;  %p45_p8 = scmp.eq.s32.totalorder %s44_s25, 0 }
   0xf   : > { %p55_p9 = scmp.eq.s32.totalorder %s565_s12, 0  ;;  %p60_p10 = scmp.ne.s32.totalorder %s557_s10, %s553_s9 }
  0x10   : > { %385 = dma.hbm_to_vmem [thread:$0]  (!%p383_p6), %s109_s15, 384, %s111_s19, [#allocation3], %s568_s20, %s568_s20, %s569_s21  }
  0x11   : > { %p84_p11 = scmp.eq.s32.totalorder %s609_s16, 1  ;;  %p641_p12 = por %p61_p1, %p60_p10 }
  0x12   : > { %s637_s26 = scalar_select %p45_p8, %s561_s11, %s47_s24  }
  0x13   : > { %p645_p13 = por %p84_p11, %p54_p7  ;;  %p90_p0 = scmp.eq.s32.totalorder %s344_s22, 1 }
  0x14   : > { %p56_p2 = por %p55_p9, %p54_p7  ;;  %s124_s29 = sand.u32 1, %s561_s11  }
  0x15   : > { %p650_p4 = por %p90_p0, %p60_p10  ;;  %p395_p6 = scmp.lt.s32.totalorder %s565_s12, 2 }
  0x16   : > { %s348_s3 = sshll.u32 %s124_s29, 2  ;;  %s349_s4 = sshll.u32 %s565_s12, 2 }
  0x17   : > { %s132_s7 = scalar_lea.hbm %s726_s1, %s349_s4  ;;  %s128_s13 = scalar_lea.vmem [#allocation5], %s348_s3 }
  0x18   : > { %s134_s8 = sshll.u32 %s132_s7, 4  ;;  %s136_s14 = sshll.u32 %s128_s13, 4  ;;  %s135_s8 = int_to_ptr.hbm [resolvable:$true] %s134_s8  ;;  %s137_s14 = int_to_ptr.vmem [resolvable:$true] %s136_s14 }
  0x19   : > { %p659_p8 = pnand %p395_p6, %p56_p2  ;;  %s125_s18 = scalar_lea.sflag [#allocation6], %s124_s29 }
  0x1a   : > { %s465_s19 = sshra.s32 %s135_s8, 4  ;;  %s472_s24 = scalar_lea.hbm %s726_s1, 8  ;;  %s466_s19 = int_to_ptr.hbm [resolvable:$true] %s465_s19 }
  0x1b   : > { %s467_s20 = scalar_lea.hbm %s466_s19, 4  ;;  %p469_p9 = pneg %p659_p8 }
  0x1c   : > { %p468_p7 = scmp.ne.s32.totalorder %s466_s19, %s467_s20  ;;  %p473_p0 = scmp.lt.s32.totalorder %s466_s19, %s726_s1 }
  0x1d   : > { %p474_p2 = scmp.lt.s32.totalorder %s472_s24, %s467_s20 }
  0x1e   : > { %p470_p10 = pnand %p469_p9, %p468_p7 }
  0x1f   : > { %p475_p6 = por %p474_p2, %p473_p0 }
  0x20   : > { %p471_p11 = pneg %p470_p10 }
  0x22   : > { %p476_p5 = pnand %p475_p6, %p471_p11 }
  0x24   : > { %479 = shalt.err (!%p476_p5)
}
  0x25   : > { %389 = dma.hbm_to_vmem [thread:$0]  (!%p659_p8), %s135_s8, 64, %s137_s14, %s125_s18  }
  0x26   : > { %145 = sbr.rel (%p614_p3) target bundleno = 343 (0x157), region = 28 }
  0x2b   : > { %540 = dma.done.wait (%p61_p1), [#allocation3], 384  }
  0x2c   : > { %542 = vsyncadd (%p61_p1), [#allocation3], 4294966912  ;;  %s680_s29 = sand.u32 1, %s557_s10  }
  0x2d   : > { %s352_s4 = sshll.u32 %s680_s29, 2  ;;  %s153_s5 = scalar_lea.sflag [#allocation6], %s680_s29 }
  0x2e   : > { %s156_s6 = scalar_lea.vmem [#allocation5], %s352_s4 }
  0x2f   : > { %544 = dma.done.wait (%p641_p12), %s153_s5, 64  }
  0x30   : > { %546 = vsyncadd (%p641_p12), %s153_s5, 4294967232  ;;  %v373_v0 = vld [vmem:[#allocation2 + $0x10] sm:$0xff]  ;;  %v372_v1 = vld [vmem:[#allocation2 + $0x8] sm:$0xff]  ;;  %vm204_vm0 = vcmask 392192   ;;  %s368_s17 = sshll.u32 %s609_s16, 2  ;;  %s177_s13 = scalar_lea.vmem [#allocation7], %s352_s4 }
  0x31   : > { %213 = vmatpush.bf16.msra.mxu0 %v373_v0  ;;  %v371_v2 = vld [vmem:[#allocation2] sm:$0xff]  ;;  %v179_v3 = vld [vmem:[%s156_s6] sm:$0xf]  ;;  %s257_s8 = scalar_lea.hbm %s727_s2, %s368_s17  ;;  %s259_s14 = sshll.u32 %s177_s13, 4  ;;  %s260_s14 = int_to_ptr.vmem [resolvable:$true] %s259_s14 }
  0x32   : > { %s261_s15 = sshll.u32 %s257_s8, 4  ;;  %s247_s16 = scalar_lea.sflag [#allocation4], %s680_s29  ;;  %s262_s15 = int_to_ptr.hbm [resolvable:$true] %s261_s15 }
  0x33   : > { %s509_s18 = sshra.s32 %s262_s15, 4  ;;  %s515_s22 = scalar_lea.hbm %s727_s2, 8  ;;  %s510_s18 = int_to_ptr.hbm [resolvable:$true] %s509_s18 }
  0x34   : > { %s511_s19 = scalar_lea.hbm %s510_s18, 4  ;;  %p516_p12 = scmp.lt.s32.totalorder %s510_s18, %s727_s2 }
  0x35   : > { %214 = vmatpush.bf16.msra.mxu0 %v372_v1  ;;  %p512_p1 = scmp.ne.s32.totalorder %s510_s18, %s511_s19  ;;  %p517_p8 = scmp.lt.s32.totalorder %s515_s22, %s511_s19 }
  0x37   : > { %p513_p3 = pnand %p512_p1, %p645_p13  ;;  %p518_p7 = por %p517_p8, %p516_p12 }
  0x39   : > { %215 = vmatpush.bf16.msra.mxu0 %v371_v2  ;;  %p514_p5 = pneg %p513_p3 }
  0x3b   : > { %p519_p9 = pnand %p518_p7, %p514_p5 }
  0x3c   : > { %366 = vmatmul.msk.bf16.vlgmr.msra.gmra.mxu0 %vm204_vm0, %v179_v3 }
  0xb9   : > { %v217_v4 = vpop.f32.mrf.mxu0 }
  0xba   : > { %221 = vadd.xlane.f32.xlu0 %v217_v4  ;;  %v224_v5 = vmul.f32 %v217_v4, %v217_v4 }
  0xc1   : > { %v219_v6 = vpop.f32.mrf.mxu0 }
  0xc2   : > { %225 = vadd.xlane.f32.xlu0 %v224_v5 }
 0x12d   : > { %v222_v7 = vpop.xlane.xlu0 %221 }
 0x12e   : > { %v223_v8 = vmul.f32 0.03125, %v222_v7 }
 0x130   : > { %v228_v10 = vmul.f32 %v223_v8, %v223_v8  ;;  %v230_v20 = vsub.f32 %v217_v4, %v223_v8 }
 0x135   : > { %v226_v9 = vpop.xlane.xlu0 %225 }
 0x136   : > { %v227_v11 = vmul.f32 0.03125, %v226_v9 }
 0x138   : > { %v229_v12 = vsub.f32 %v227_v11, %v228_v10 }
 0x13a   : > { %v231_v13 = vadd.f32 1e-05, %v229_v12 }
 0x13c   : > { %433 = vrsqrt.f32 %v231_v13  ;;  %vm238_vm2 = vweird.f32 %v231_v13 }
 0x142   : > { %v434_v14 = vpop.eup %433 }
 0x143   : > { %v233_v15 = vmul.f32 %v434_v14, %v231_v13  ;;  %vm239_vm1 = vweird.f32 %v434_v14 }
 0x144   : > { %vm240_vm3 = vmor %vm238_vm2, %vm239_vm1 }
 0x145   : > { %v234_v16 = vmul.f32 %v434_v14, %v233_v15 }
 0x147   : > { %v235_v17 = vmul.f32 0.5, %v234_v16 }
 0x149   : > { %v236_v18 = vsub.f32 1.5, %v235_v17 }
 0x14b   : > { %v237_v19 = vmul.f32 %v434_v14, %v236_v18 }
 0x14d   : > { %v241_v21 = vsel %vm240_vm3, %v434_v14, %v237_v19 }
 0x14e   : > { %v242_v22 = vmul.f32 %v241_v21, %v230_v20 }
 0x150   : > { %v243_v23 = vmax.f32 %v242_v22, 0.0 }
 0x152   : > { %v244_v24 = vpack.c.bf16 %v243_v23, %v243_v23 }
 0x154   : > { %245 = vst [vmem:[%s177_s13] sm:$0xf] %v244_v24 }
 0x155   : > { %522 = shalt.err (!%p519_p9)
}
 0x156   : > { %380 = dma.vmem_to_hbm [thread:$0]  (%p645_p13), %s260_s14, 64, %s262_s15, %s247_s16  }
 0x157 PF: > { %s273_s3 = sand.u32 1, %s553_s9   ;;  %p733_p10 = scmp.ge.s32.totalorder %s565_s12, 2 }
 0x158   : > { %s274_s29 = scalar_lea.sflag [#allocation4], %s273_s3 }
 0x159   : > { %p391_p11 = pnand %p733_p10, %p650_p4 }
 0x15b   : > { %p392_p0 = pneg %p391_p11 }
 0x15d   : > { %548 = dma.done.wait (%p392_p0), %s274_s29, 64  }
 0x15e   : > { %550 = vsyncadd (%p392_p0), %s274_s29, 4294967232  ;;  %p16_p2 = scmp.ge.s32.totalorder %s625_s23, 4   ;;  %s734_s9 = smov %s557_s10 }
 0x15f   : > { %s735_s10 = smov %s561_s11  ;;  %s736_s11 = smov %s637_s26 }
 0x160   : > { %s737_s12 = smov %s625_s23  ;;  %18 = sbr.rel (!%p16_p2) target bundleno = 6 (0x6), region = 78 }
 0x165   :  { %280 = vsyncpa [#allocation3], 1 }
 0x166   :  { %282 = vsyncpa [#allocation3 + $0x1], 1 }
 0x167   :  { %283 = vsyncpa [#allocation6], 1 }
 0x168   :  { %285 = vsyncpa [#allocation6 + $0x1], 1 }
 0x169   :  { %286 = vsyncpa [#allocation4], 1 }
 0x16a   :  { %288 = vsyncpa [#allocation4 + $0x1], 1 }

</bundles_post_ra>
